<compile_context>
chip_gen: v7x
topology: tpu7x:2x2x1
jax: 0.10.0
libtpu: 0.0.40
codegen_flags: <defaults>
</compile_context>

<pallas_src>
import functools

import jax
import jax.numpy as jnp
from jax import lax
from jax.experimental import pallas as pl
from jax.experimental.pallas import tpu as pltpu

# Large finite negative instead of -inf: keeps exp()/max() NaN-free when a whole
# tile (or row) is masked out.
MASK_VALUE = -0.7 * float(jnp.finfo(jnp.float32).max)


def _round_up(x, m):
    return ((x + m - 1) // m) * m


# --------------------------------------------------------------------------- #
# Kernel bodies
# --------------------------------------------------------------------------- #
def _init_accumulators(q_ref, q_sc, m_sc, l_sc, acc_sc, scale, dot_dtype):
    # Pre-scale Q once per q tile (in f32, then matmul dtype) instead of per kv step.
    q_sc[...] = (q_ref[0].astype(jnp.float32) * scale).astype(dot_dtype)
    m_sc[...] = jnp.full_like(m_sc, MASK_VALUE)
    l_sc[...] = jnp.zeros_like(l_sc)
    acc_sc[...] = jnp.zeros_like(acc_sc)


def _online_softmax_update(s, v, m_sc, l_sc, acc_sc):
    """Fold one scores tile `s` (f32) into the running (m, l, acc) accumulators."""
    m_prev = m_sc[...]                                            # (tq, 1)
    m_new = jnp.maximum(m_prev, jnp.max(s, axis=-1, keepdims=True))
    alpha = jnp.exp(m_prev - m_new)                               # (tq, 1)
    p = jnp.exp(s - m_new)                                        # (tq, tk) f32
    l_sc[...] = alpha * l_sc[...] + jnp.sum(p, axis=-1, keepdims=True)
    # P @ V on the MXU in V's native dtype; accumulate in f32.
    acc_sc[...] = alpha * acc_sc[...] + lax.dot_general(
        p.astype(v.dtype), v, (((1,), (0,)), ((), ())),
        preferred_element_type=jnp.float32)
    m_sc[...] = m_new


def _finalize(o_ref, l_sc, acc_sc):
    l = l_sc[...]
    # Exact reciprocal (runs once per q tile). Rows where every kv tile was
    # skipped (l == 0) produce 0 instead of inf/NaN.
    inv = 1.0 / jnp.where(l == 0.0, 1.0, l)
    o_ref[0] = (acc_sc[...] * inv).astype(o_ref.dtype)


def _sdpa_kernel_masked(flag_ref, kvfetch_ref, mfetch_ref,
                        q_ref, k_ref, v_ref, mask_ref, o_ref,
                        q_sc, m_sc, l_sc, acc_sc,
                        *, scale, dot_dtype, n_q, n_kv):
    # q_ref: (1, tq, Dk), k_ref: (1, tk, Dk), v_ref: (1, tk, Dv_p),
    # mask_ref: (1, tq, tk) int8, o_ref: (1, tq, Dv_p)
    b = pl.program_id(0)
    qi = pl.program_id(1)
    kv = pl.program_id(2)
    flag = flag_ref[(b * n_q + qi) * n_kv + kv]   # 0=skip, 1=mixed, 2=all-kept

    @pl.when(kv == 0)
    def _():
        _init_accumulators(q_ref, q_sc, m_sc, l_sc, acc_sc, scale, dot_dtype)

    @pl.when(flag > 0)        # block-sparse skip of fully-masked kv tiles
    def _():
        # Q @ K^T without materializing a transpose: contract last dims.
        s = lax.dot_general(q_sc[...], k_ref[0], (((1,), (1,)), ((), ())),
                            preferred_element_type=jnp.float32)
        # For all-kept tiles (flag == 2) the (possibly stale) mask tile is ignored.
        keep = jnp.logical_or(mask_ref[0] != 0, flag == 2)
        s = jnp.where(keep, s, MASK_VALUE)
        _online_softmax_update(s, v_ref[0], m_sc, l_sc, acc_sc)

    @pl.when(kv == n_kv - 1)
    def _():
        _finalize(o_ref, l_sc, acc_sc)


def _sdpa_kernel_nomask(q_ref, k_ref, v_ref, o_ref,
                        q_sc, m_sc, l_sc, acc_sc,
                        *, scale, dot_dtype, sk_valid, tk, need_kv_mask):
    kv = pl.program_id(2)
    n_kv = pl.num_programs(2)

    @pl.when(kv == 0)
    def _():
        _init_accumulators(q_ref, q_sc, m_sc, l_sc, acc_sc, scale, dot_dtype)

    s = lax.dot_general(q_sc[...], k_ref[0], (((1,), (1,)), ((), ())),
                        preferred_element_type=jnp.float32)
    if need_kv_mask:   # static: only emitted when Sk was padded up to a tile multiple
        col = kv * tk + lax.broadcasted_iota(jnp.int32, s.shape, 1)
        s = jnp.where(col < sk_valid, s, MASK_VALUE)
    _online_softmax_update(s, v_ref[0], m_sc, l_sc, acc_sc)

    @pl.when(kv == n_kv - 1)
    def _():
        _finalize(o_ref, l_sc, acc_sc)


# --------------------------------------------------------------------------- #
# Wrapper
# --------------------------------------------------------------------------- #
def scaled_dot_product_attention(Q, K, V, mask=None, *,
                                 block_q=512, block_k=1024,
                                 prefer_bf16_matmul=True):
    """Pallas implementation of ScaledDotProductAttention.forward.

    Q: (..., Sq, Dk), K: (..., Sk, Dk), V: (..., Sk, Dv),
    mask: optional (..., Sq, Sk) bool (True = keep).  Returns (..., Sq, Dv).
    """
    *lead, Sq, Dk = Q.shape
    Sk = K.shape[-2]
    Dv = V.shape[-1]
    out_dtype = Q.dtype
    BH = 1
    for d in lead:
        BH *= d

    # bf16 MXU path for f32 inputs (f32 accumulation); keep native dtype otherwise.
    if prefer_bf16_matmul and Q.dtype == jnp.float32:
        dot_dtype = jnp.bfloat16
    else:
        dot_dtype = Q.dtype

    q = Q.reshape(BH, Sq, Dk).astype(dot_dtype)
    k = K.reshape(BH, Sk, Dk).astype(dot_dtype)
    v = V.reshape(BH, Sk, Dv).astype(dot_dtype)

    # Tile sizes: large tiles amortize per-step pipeline overhead and cut K/V
    # re-streaming (K/V are re-read ceil(Sq/tq) times).  tq is a multiple of 32
    # so int8 mask tiles are natively tiled; tk a multiple of 128 (lane dim).
    tq = min(block_q, _round_up(Sq, 32))
    tk = min(block_k, _round_up(Sk, 128))
    # v7x has 2 TensorCores: keep >= 2 "parallel" grid cells when possible.
    if BH * ((Sq + tq - 1) // tq) < 2:
        tq_half = _round_up((Sq + 1) // 2, 32)
        if 0 < tq_half < tq:
            tq = tq_half

    Sq_p = _round_up(Sq, tq)
    Sk_p = _round_up(Sk, tk)
    Dv_p = _round_up(Dv, 128)   # lane-dense output stores
    # Dk (contraction dim) is left unpadded: a block last-dim equal to the full
    # array dim is legal, and padding it would double Q/K HBM traffic for Dk<128.
    n_q = Sq_p // tq
    n_kv = Sk_p // tk
    grid = (BH, n_q, n_kv)

    q = jnp.pad(q, ((0, 0), (0, Sq_p - Sq), (0, 0)))
    k = jnp.pad(k, ((0, 0), (0, Sk_p - Sk), (0, 0)))
    v = jnp.pad(v, ((0, 0), (0, Sk_p - Sk), (0, Dv_p - Dv)))

    scale = float(Dk) ** (-0.5)

    q_spec = pl.BlockSpec((1, tq, Dk), lambda b, qi, ki, *_: (b, qi, 0))
    o_spec = pl.BlockSpec((1, tq, Dv_p), lambda b, qi, ki, *_: (b, qi, 0))
    scratch = [
        pltpu.VMEM((tq, Dk), dot_dtype),      # pre-scaled Q tile
        pltpu.VMEM((tq, 1), jnp.float32),     # running max  m_i
        pltpu.VMEM((tq, 1), jnp.float32),     # running sum  l_i
        pltpu.VMEM((tq, Dv_p), jnp.float32),  # output accumulator
    ]

    # Derived VMEM budget (double-buffered blocks + scratch + headroom, <=32 MiB).
    dot_b = jnp.dtype(dot_dtype).itemsize
    out_b = jnp.dtype(out_dtype).itemsize
    blk_bytes = (tq * Dk + tk * Dk + tk * Dv_p) * dot_b + tq * Dv_p * out_b
    if mask is not None:
        blk_bytes += tq * tk                                   # int8 mask tile
    scratch_bytes = (tq * max(Dk, 128) * dot_b + tq * Dv_p * 4 + 2 * tq * 128 * 4)
    need = 2 * blk_bytes + scratch_bytes
    vmem_limit = int(max(min(need + (8 << 20), 32 << 20), need + (2 << 20)))

    cparams = pltpu.CompilerParams(
        dimension_semantics=("parallel", "parallel", "arbitrary"),
        vmem_limit_bytes=vmem_limit)

    io_bytes = (q.size + k.size + v.size) * dot_b + BH * Sq_p * Dv_p * out_b
    if mask is not None:
        io_bytes += BH * Sq_p * Sk_p
    cost = pl.CostEstimate(flops=int(2 * BH * Sq * Sk * (Dk + Dv)),
                           transcendentals=int(BH * Sq * Sk),
                           bytes_accessed=int(io_bytes))

    out_shape = jax.ShapeDtypeStruct((BH, Sq_p, Dv_p), out_dtype)

    if mask is None:
        k_spec = pl.BlockSpec((1, tk, Dk), lambda b, qi, ki: (b, ki, 0))
        v_spec = pl.BlockSpec((1, tk, Dv_p), lambda b, qi, ki: (b, ki, 0))
        kernel = functools.partial(
            _sdpa_kernel_nomask, scale=scale, dot_dtype=dot_dtype,
            sk_valid=Sk, tk=tk, need_kv_mask=(Sk_p != Sk))
        out = pl.pallas_call(
            kernel,
            out_shape=out_shape,
            grid_spec=pltpu.PrefetchScalarGridSpec(
                num_scalar_prefetch=0,
                grid=grid,
                in_specs=[q_spec, k_spec, v_spec],
                out_specs=o_spec,
                scratch_shapes=scratch),
            compiler_params=cparams,
            cost_estimate=cost,
        )(q, k, v)
    else:
        # Mask (int8: 4x less HBM traffic than int32).  Padding is 0 (= drop).
        m_bool = jnp.broadcast_to(mask, (*lead, Sq, Sk)).reshape(BH, Sq, Sk)
        m_bool = jnp.pad(m_bool, ((0, 0), (0, Sq_p - Sq), (0, Sk_p - Sk)))
        m_i8 = m_bool.astype(jnp.int8)

        # Per-tile flags: 0 = fully masked (skip), 1 = mixed, 2 = all kept.
        tiles = m_bool.reshape(BH, n_q, tq, n_kv, tk)
        any_keep = jnp.any(tiles, axis=(2, 4))                   # (BH, n_q, n_kv)
        all_keep = jnp.all(tiles, axis=(2, 4))
        flags = (any_keep.astype(jnp.int32) + all_keep.astype(jnp.int32))

        # DMA remap: for steps whose tile isn't needed, point the index_map at the
        # previously (or first) needed block so no new copy is issued.
        def fetch_map(needed):
            idx = jnp.arange(n_kv, dtype=jnp.int32)
            marked = jnp.where(needed, idx[None, None, :], jnp.int32(-1))
            last = lax.cummax(marked, axis=2)
            first = jnp.argmax(needed, axis=2).astype(jnp.int32)  # 0 if none
            return jnp.where(last >= 0, last, first[..., None]).astype(jnp.int32)

        kv_fetch = fetch_map(any_keep)                               # K/V blocks
        mask_fetch = fetch_map(jnp.logical_and(any_keep,             # mask blocks
                                               jnp.logical_not(all_keep)))

        flags_flat = flags.reshape(-1)
        kv_fetch_flat = kv_fetch.reshape(-1)
        mask_fetch_flat = mask_fetch.reshape(-1)

        def kv_idx(b, qi, ki, flag_ref, kvf_ref, mf_ref):
            return (b, kvf_ref[(b * n_q + qi) * n_kv + ki], 0)

        def m_idx(b, qi, ki, flag_ref, kvf_ref, mf_ref):
            return (b, qi, mf_ref[(b * n_q + qi) * n_kv + ki])

        k_spec = pl.BlockSpec((1, tk, Dk), kv_idx)
        v_spec = pl.BlockSpec((1, tk, Dv_p), kv_idx)
        m_spec = pl.BlockSpec((1, tq, tk), m_idx)

        kernel = functools.partial(
            _sdpa_kernel_masked, scale=scale, dot_dtype=dot_dtype,
            n_q=n_q, n_kv=n_kv)
        out = pl.pallas_call(
            kernel,
            out_shape=out_shape,
            grid_spec=pltpu.PrefetchScalarGridSpec(
                num_scalar_prefetch=3,
                grid=grid,
                in_specs=[q_spec, k_spec, v_spec, m_spec],
                out_specs=o_spec,
                scratch_shapes=scratch),
            compiler_params=cparams,
            cost_estimate=cost,
        )(flags_flat, kv_fetch_flat, mask_fetch_flat, q, k, v, m_i8)

    out = out[:, :Sq, :Dv]
    return out.reshape(*lead, Sq, Dv)


# --------------------------------------------------------------------------- #
# Reference + tests
# --------------------------------------------------------------------------- #
def _reference(Q, K, V, mask=None, dot_dtype=jnp.float32):
    d_k = Q.shape[-1]
    scaling = d_k ** (-0.5)
    q = (Q.astype(jnp.float32) * scaling).astype(dot_dtype)
    kk = K.astype(dot_dtype)
    vv = V.astype(dot_dtype)
    s = jnp.einsum("...qd,...kd->...qk", q, kk,
                   preferred_element_type=jnp.float32)
    if mask is not None:
        s = jnp.where(mask, s, -jnp.inf)
    p = jax.nn.softmax(s.astype(jnp.float32), axis=-1)
    return jnp.einsum("...qk,...kd->...qd", p.astype(dot_dtype), vv,
                      preferred_element_type=jnp.float32)


if __name__ == "__main__":
    key = jax.random.PRNGKey(0)

    # Small shapes consistent with the module.
    B, H, S, Dk, Dv = 2, 4, 8, 32, 32
    kq, kk, kv_, k2 = jax.random.split(key, 4)
    Q = jax.random.normal(kq, (B, H, S, Dk), dtype=jnp.float32)
    K = jax.random.normal(kk, (B, H, S, Dk), dtype=jnp.float32)
    V = jax.random.normal(kv_, (B, H, S, Dv), dtype=jnp.float32)
    causal = jnp.tril(jnp.ones((S, S), dtype=bool))
    mask = jnp.broadcast_to(causal, (B, H, S, S))

    # Masked path (default bf16-MXU path) vs. precision-matched reference.
    out = jax.block_until_ready(scaled_dot_product_attention(Q, K, V, mask))
    ref = _reference(Q, K, V, mask, dot_dtype=jnp.bfloat16)
    assert out.shape == (B, H, S, Dv)
    assert out.dtype == Q.dtype
    assert jnp.allclose(out, ref, atol=1e-2, rtol=1e-2)

    # No-mask path (mask operand skipped entirely; exercises in-kernel Sk tail mask).
    out_nm = jax.block_until_ready(scaled_dot_product_attention(Q, K, V, None))
    ref_nm = _reference(Q, K, V, None, dot_dtype=jnp.bfloat16)
    assert jnp.allclose(out_nm, ref_nm, atol=1e-2, rtol=1e-2)

    # Larger case: multiple q/kv tiles, exercises the online softmax, the
    # block-sparse skip of fully-masked upper-triangle kv tiles (and the
    # K/V / mask DMA remap) and the exact f32 matmul path.
    B2, H2, S2, D2 = 1, 2, 256, 64
    kq2, kk2, kv2 = jax.random.split(k2, 3)
    Q2 = jax.random.normal(kq2, (B2, H2, S2, D2), dtype=jnp.float32)
    K2 = jax.random.normal(kk2, (B2, H2, S2, D2), dtype=jnp.float32)
    V2 = jax.random.normal(kv2, (B2, H2, S2, D2), dtype=jnp.float32)
    mask2 = jnp.broadcast_to(jnp.tril(jnp.ones((S2, S2), dtype=bool)),
                             (B2, H2, S2, S2))
    out2 = jax.block_until_ready(scaled_dot_product_attention(
        Q2, K2, V2, mask2, block_q=128, block_k=128, prefer_bf16_matmul=False))
    ref2 = _reference(Q2, K2, V2, mask2, dot_dtype=jnp.float32)
    assert jnp.allclose(out2, ref2, atol=2e-3, rtol=2e-3)

    # TODO(synk): rows whose mask is entirely False return 0 (or a uniform
    # average within partially-kept tiles) instead of the NaN that PyTorch's
    # masked_fill(-inf)+softmax produces.

    print("KERNEL_OK")
</pallas_src>

<mosaic_0001>
module attributes {stable_mosaic.version = 11 : i64} {
  func.func @_sdpa_kernel_masked(%arg0: i32, %arg1: i32, %arg2: i32, %arg3: memref<8xi32, #tpu.memory_space<smem>>, %arg4: memref<8xi32, #tpu.memory_space<smem>>, %arg5: memref<8xi32, #tpu.memory_space<smem>>, %arg6: memref<1x32x32xbf16, #tpu.memory_space<vmem>>, %arg7: memref<1x128x32xbf16, #tpu.memory_space<vmem>>, %arg8: memref<1x128x128xbf16, #tpu.memory_space<vmem>>, %arg9: memref<1x32x128xi8, #tpu.memory_space<vmem>>, %arg10: memref<1x32x128xf32, #tpu.memory_space<vmem>>, %arg11: memref<32x32xbf16, #tpu.memory_space<vmem>>, %arg12: memref<32x1xf32, #tpu.memory_space<vmem>>, %arg13: memref<32x1xf32, #tpu.memory_space<vmem>>, %arg14: memref<32x128xf32, #tpu.memory_space<vmem>>) attributes {dimension_semantics = [#tpu.dimension_semantics<parallel>, #tpu.dimension_semantics<parallel>, #tpu.dimension_semantics<arbitrary>], iteration_bounds = array<i64: 8, 1, 1>, scalar_prefetch = 3 : i64, scratch_operands = 4 : i64, tpu.core_type = #tpu.core_type<tc>, window_params = [{transform_indices = @transform_0, window_bounds = array<i64: 1, 32, 32>}, {transform_indices = @transform_1, window_bounds = array<i64: 1, 128, 32>}, {transform_indices = @transform_2, window_bounds = array<i64: 1, 128, 128>}, {transform_indices = @transform_3, window_bounds = array<i64: 1, 32, 128>}, {transform_indices = @transform_4, window_bounds = array<i64: 1, 32, 128>}]} {
    %c1_i32 = arith.constant 1 : i32
    %0 = arith.muli %arg0, %c1_i32 : i32
    %1 = arith.addi %0, %arg1 : i32
    %c1_i32_0 = arith.constant 1 : i32
    %2 = arith.muli %1, %c1_i32_0 : i32
    %3 = arith.addi %2, %arg2 : i32
    %4 = arith.index_cast %3 : i32 to index
    %5 = memref.load %arg3[%4] : memref<8xi32, #tpu.memory_space<smem>>
    %c0_i32 = arith.constant 0 : i32
    %6 = arith.cmpi eq, %arg2, %c0_i32 : i32
    %7 = arith.extui %6 : i1 to i32
    %c0_i32_1 = arith.constant 0 : i32
    %8 = arith.cmpi ne, %7, %c0_i32_1 : i32
    scf.if %8 {
      %c0 = arith.constant 0 : index
      %c0_6 = arith.constant 0 : index
      %c0_7 = arith.constant 0 : index
      %15 = vector.load %arg6[%c0, %c0_6, %c0_7] : memref<1x32x32xbf16, #tpu.memory_space<vmem>>, vector<1x32x32xbf16>
      %16 = vector.shape_cast %15 : vector<1x32x32xbf16> to vector<32x32xbf16>
      %17 = arith.extf %16 : vector<32x32xbf16> to vector<32x32xf32>
      %cst = arith.constant 0.176776692 : f32
      %18 = vector.broadcast %cst : f32 to vector<32x32xf32>
      %19 = arith.mulf %17, %18 : vector<32x32xf32>
      %20 = arith.truncf %19 : vector<32x32xf32> to vector<32x32xbf16>
      %c0_8 = arith.constant 0 : index
      %c0_9 = arith.constant 0 : index
      %21 = vector.load %arg11[%c0_8, %c0_9] : memref<32x32xbf16, #tpu.memory_space<vmem>>, vector<32x32xbf16>
      tpu.vector_store %arg11[%c0_8, %c0_9], %20 {strides = array<i32>} : memref<32x32xbf16, #tpu.memory_space<vmem>>, vector<32x32xbf16>,
      %cst_10 = arith.constant -2.38197633E+38 : f32
      %22 = vector.broadcast %cst_10 : f32 to vector<32x1xf32>
      %c0_11 = arith.constant 0 : index
      %c0_12 = arith.constant 0 : index
      %23 = vector.load %arg12[%c0_11, %c0_12] : memref<32x1xf32, #tpu.memory_space<vmem>>, vector<32x1xf32>
      tpu.vector_store %arg12[%c0_11, %c0_12], %22 {strides = array<i32>} : memref<32x1xf32, #tpu.memory_space<vmem>>, vector<32x1xf32>,
      %cst_13 = arith.constant 0.000000e+00 : f32
      %24 = vector.broadcast %cst_13 : f32 to vector<32x1xf32>
      %c0_14 = arith.constant 0 : index
      %c0_15 = arith.constant 0 : index
      %25 = vector.load %arg13[%c0_14, %c0_15] : memref<32x1xf32, #tpu.memory_space<vmem>>, vector<32x1xf32>
      tpu.vector_store %arg13[%c0_14, %c0_15], %24 {strides = array<i32>} : memref<32x1xf32, #tpu.memory_space<vmem>>, vector<32x1xf32>,
      %cst_16 = arith.constant 0.000000e+00 : f32
      %26 = vector.broadcast %cst_16 : f32 to vector<32x128xf32>
      %c0_17 = arith.constant 0 : index
      %c0_18 = arith.constant 0 : index
      %27 = vector.load %arg14[%c0_17, %c0_18] : memref<32x128xf32, #tpu.memory_space<vmem>>, vector<32x128xf32>
      tpu.vector_store %arg14[%c0_17, %c0_18], %26 {strides = array<i32>} : memref<32x128xf32, #tpu.memory_space<vmem>>, vector<32x128xf32>,
    } else {
    }
    %c0_i32_2 = arith.constant 0 : i32
    %9 = arith.cmpi sgt, %5, %c0_i32_2 : i32
    %10 = arith.extui %9 : i1 to i32
    %c0_i32_3 = arith.constant 0 : i32
    %11 = arith.cmpi ne, %10, %c0_i32_3 : i32
    scf.if %11 {
      %c0 = arith.constant 0 : index
      %c0_6 = arith.constant 0 : index
      %15 = vector.load %arg11[%c0, %c0_6] : memref<32x32xbf16, #tpu.memory_space<vmem>>, vector<32x32xbf16>
      %c0_7 = arith.constant 0 : index
      %c0_8 = arith.constant 0 : index
      %c0_9 = arith.constant 0 : index
      %16 = vector.load %arg7[%c0_7, %c0_8, %c0_9] : memref<1x128x32xbf16, #tpu.memory_space<vmem>>, vector<1x128x32xbf16>
      %17 = vector.shape_cast %16 : vector<1x128x32xbf16> to vector<128x32xbf16>
      %cst = arith.constant dense<0.000000e+00> : vector<32x128xf32>
      %18 = tpu.matmul %15, %17, %cst {dimension_numbers = #tpu.dot_dimension_numbers<[1], [1], [0], [0], [0, 0, 1, 0], [], []>} : vector<32x32xbf16>, vector<128x32xbf16>, vector<32x128xf32> -> vector<32x128xf32>
      %c0_10 = arith.constant 0 : index
      %c0_11 = arith.constant 0 : index
      %c0_12 = arith.constant 0 : index
      %19 = vector.load %arg9[%c0_10, %c0_11, %c0_12] : memref<1x32x128xi8, #tpu.memory_space<vmem>>, vector<1x32x128xi8>
      %20 = vector.shape_cast %19 : vector<1x32x128xi8> to vector<32x128xi8>
      %c0_i8 = arith.constant 0 : i8
      %21 = vector.broadcast %c0_i8 : i8 to vector<32x128xi8>
      %22 = arith.cmpi ne, %20, %21 : vector<32x128xi8>
      %c2_i32 = arith.constant 2 : i32
      %23 = arith.cmpi eq, %5, %c2_i32 : i32
      %24 = vector.broadcast %23 : i1 to vector<32x128xi1>
      %25 = arith.ori %22, %24 : vector<32x128xi1>
      %cst_13 = arith.constant -2.38197633E+38 : f32
      %26 = vector.broadcast %cst_13 : f32 to vector<32x128xf32>
      %27 = arith.select %25, %18, %26 : vector<32x128xi1>, vector<32x128xf32>
      %c0_14 = arith.constant 0 : index
      %c0_15 = arith.constant 0 : index
      %c0_16 = arith.constant 0 : index
      %28 = vector.load %arg8[%c0_14, %c0_15, %c0_16] : memref<1x128x128xbf16, #tpu.memory_space<vmem>>, vector<1x128x128xbf16>
      %29 = vector.shape_cast %28 : vector<1x128x128xbf16> to vector<128x128xbf16>
      %c0_17 = arith.constant 0 : index
      %c0_18 = arith.constant 0 : index
      %30 = vector.load %arg12[%c0_17, %c0_18] : memref<32x1xf32, #tpu.memory_space<vmem>>, vector<32x1xf32>
      %cst_19 = arith.constant dense<0xFF800000> : vector<32xf32>
      %31 = vector.multi_reduction <maximumf>, %27, %cst_19 [1] : vector<32x128xf32> to vector<32xf32>
      %32 = vector.shape_cast %31 : vector<32xf32> to vector<32x1xf32>
      %33 = arith.maximumf %30, %32 : vector<32x1xf32>
      %34 = arith.subf %30, %33 : vector<32x1xf32>
      %35 = math.exp %34 : vector<32x1xf32>
      %36 = vector.broadcast %33 : vector<32x1xf32> to vector<32x128xf32>
      %37 = arith.subf %27, %36 : vector<32x128xf32>
      %38 = math.exp %37 : vector<32x128xf32>
      %c0_20 = arith.constant 0 : index
      %c0_21 = arith.constant 0 : index
      %39 = vector.load %arg13[%c0_20, %c0_21] : memref<32x1xf32, #tpu.memory_space<vmem>>, vector<32x1xf32>
      %40 = arith.mulf %35, %39 : vector<32x1xf32>
      %cst_22 = arith.constant dense<0.000000e+00> : vector<32xf32>
      %41 = vector.multi_reduction <add>, %38, %cst_22 [1] : vector<32x128xf32> to vector<32xf32>
      %42 = vector.shape_cast %41 : vector<32xf32> to vector<32x1xf32>
      %43 = arith.addf %40, %42 : vector<32x1xf32>
      %c0_23 = arith.constant 0 : index
      %c0_24 = arith.constant 0 : index
      %44 = vector.load %arg13[%c0_23, %c0_24] : memref<32x1xf32, #tpu.memory_space<vmem>>, vector<32x1xf32>
      tpu.vector_store %arg13[%c0_23, %c0_24], %43 {strides = array<i32>} : memref<32x1xf32, #tpu.memory_space<vmem>>, vector<32x1xf32>,
      %c0_25 = arith.constant 0 : index
      %c0_26 = arith.constant 0 : index
      %45 = vector.load %arg14[%c0_25, %c0_26] : memref<32x128xf32, #tpu.memory_space<vmem>>, vector<32x128xf32>
      %46 = vector.broadcast %35 : vector<32x1xf32> to vector<32x128xf32>
      %47 = arith.mulf %46, %45 : vector<32x128xf32>
      %48 = arith.truncf %38 : vector<32x128xf32> to vector<32x128xbf16>
      %cst_27 = arith.constant dense<0.000000e+00> : vector<32x128xf32>
      %49 = tpu.matmul %48, %29, %cst_27 {dimension_numbers = #tpu.dot_dimension_numbers<[1], [0], [0], [1], [0, 0, 1, 1], [], []>} : vector<32x128xbf16>, vector<128x128xbf16>, vector<32x128xf32> -> vector<32x128xf32>
      %50 = arith.addf %47, %49 : vector<32x128xf32>
      %c0_28 = arith.constant 0 : index
      %c0_29 = arith.constant 0 : index
      %51 = vector.load %arg14[%c0_28, %c0_29] : memref<32x128xf32, #tpu.memory_space<vmem>>, vector<32x128xf32>
      tpu.vector_store %arg14[%c0_28, %c0_29], %50 {strides = array<i32>} : memref<32x128xf32, #tpu.memory_space<vmem>>, vector<32x128xf32>,
      %c0_30 = arith.constant 0 : index
      %c0_31 = arith.constant 0 : index
      %52 = vector.load %arg12[%c0_30, %c0_31] : memref<32x1xf32, #tpu.memory_space<vmem>>, vector<32x1xf32>
      tpu.vector_store %arg12[%c0_30, %c0_31], %33 {strides = array<i32>} : memref<32x1xf32, #tpu.memory_space<vmem>>, vector<32x1xf32>,
    } else {
    }
    %c0_i32_4 = arith.constant 0 : i32
    %12 = arith.cmpi eq, %arg2, %c0_i32_4 : i32
    %13 = arith.extui %12 : i1 to i32
    %c0_i32_5 = arith.constant 0 : i32
    %14 = arith.cmpi ne, %13, %c0_i32_5 : i32
    scf.if %14 {
      %c0 = arith.constant 0 : index
      %c0_6 = arith.constant 0 : index
      %15 = vector.load %arg13[%c0, %c0_6] : memref<32x1xf32, #tpu.memory_space<vmem>>, vector<32x1xf32>
      %cst = arith.constant 0.000000e+00 : f32
      %16 = vector.broadcast %cst : f32 to vector<32x1xf32>
      %17 = arith.cmpf oeq, %15, %16 : vector<32x1xf32>
      %cst_7 = arith.constant 1.000000e+00 : f32
      %18 = vector.broadcast %cst_7 : f32 to vector<32x1xf32>
      %19 = arith.select %17, %18, %15 : vector<32x1xi1>, vector<32x1xf32>
      %cst_8 = arith.constant 1.000000e+00 : f32
      %20 = vector.broadcast %cst_8 : f32 to vector<32x1xf32>
      %21 = arith.divf %20, %19 : vector<32x1xf32>
      %c0_9 = arith.constant 0 : index
      %c0_10 = arith.constant 0 : index
      %22 = vector.load %arg14[%c0_9, %c0_10] : memref<32x128xf32, #tpu.memory_space<vmem>>, vector<32x128xf32>
      %23 = vector.broadcast %21 : vector<32x1xf32> to vector<32x128xf32>
      %24 = arith.mulf %22, %23 : vector<32x128xf32>
      %c0_11 = arith.constant 0 : index
      %c0_12 = arith.constant 0 : index
      %c0_13 = arith.constant 0 : index
      %25 = vector.load %arg10[%c0_11, %c0_12, %c0_13] : memref<1x32x128xf32, #tpu.memory_space<vmem>>, vector<1x32x128xf32>
      %26 = vector.shape_cast %25 : vector<1x32x128xf32> to vector<32x128xf32>
      %27 = vector.shape_cast %24 : vector<32x128xf32> to vector<1x32x128xf32>
      tpu.vector_store %arg10[%c0_11, %c0_12, %c0_13], %27 {strides = array<i32>} : memref<1x32x128xf32, #tpu.memory_space<vmem>>, vector<1x32x128xf32>,
    } else {
    }
    return
  }
  func.func @transform_0(%arg0: i32, %arg1: i32, %arg2: i32, %arg3: memref<8xi32, #tpu.memory_space<smem>>, %arg4: memref<8xi32, #tpu.memory_space<smem>>, %arg5: memref<8xi32, #tpu.memory_space<smem>>) -> (i32, i32, i32) {
    %c0_i32 = arith.constant 0 : i32
    %c0_i32_0 = arith.constant 0 : i32
    return %arg0, %arg1, %c0_i32 : i32, i32, i32
  }
  func.func @transform_1(%arg0: i32, %arg1: i32, %arg2: i32, %arg3: memref<8xi32, #tpu.memory_space<smem>>, %arg4: memref<8xi32, #tpu.memory_space<smem>>, %arg5: memref<8xi32, #tpu.memory_space<smem>>) -> (i32, i32, i32) {
    %c1_i32 = arith.constant 1 : i32
    %0 = arith.muli %arg0, %c1_i32 : i32
    %1 = arith.addi %0, %arg1 : i32
    %c1_i32_0 = arith.constant 1 : i32
    %2 = arith.muli %1, %c1_i32_0 : i32
    %3 = arith.addi %2, %arg2 : i32
    %4 = arith.index_cast %3 : i32 to index
    %5 = memref.load %arg4[%4] : memref<8xi32, #tpu.memory_space<smem>>
    %c0_i32 = arith.constant 0 : i32
    %c0_i32_1 = arith.constant 0 : i32
    return %arg0, %5, %c0_i32 : i32, i32, i32
  }
  func.func @transform_2(%arg0: i32, %arg1: i32, %arg2: i32, %arg3: memref<8xi32, #tpu.memory_space<smem>>, %arg4: memref<8xi32, #tpu.memory_space<smem>>, %arg5: memref<8xi32, #tpu.memory_space<smem>>) -> (i32, i32, i32) {
    %c1_i32 = arith.constant 1 : i32
    %0 = arith.muli %arg0, %c1_i32 : i32
    %1 = arith.addi %0, %arg1 : i32
    %c1_i32_0 = arith.constant 1 : i32
    %2 = arith.muli %1, %c1_i32_0 : i32
    %3 = arith.addi %2, %arg2 : i32
    %4 = arith.index_cast %3 : i32 to index
    %5 = memref.load %arg4[%4] : memref<8xi32, #tpu.memory_space<smem>>
    %c0_i32 = arith.constant 0 : i32
    %c0_i32_1 = arith.constant 0 : i32
    return %arg0, %5, %c0_i32 : i32, i32, i32
  }
  func.func @transform_3(%arg0: i32, %arg1: i32, %arg2: i32, %arg3: memref<8xi32, #tpu.memory_space<smem>>, %arg4: memref<8xi32, #tpu.memory_space<smem>>, %arg5: memref<8xi32, #tpu.memory_space<smem>>) -> (i32, i32, i32) {
    %c1_i32 = arith.constant 1 : i32
    %0 = arith.muli %arg0, %c1_i32 : i32
    %1 = arith.addi %0, %arg1 : i32
    %c1_i32_0 = arith.constant 1 : i32
    %2 = arith.muli %1, %c1_i32_0 : i32
    %3 = arith.addi %2, %arg2 : i32
    %4 = arith.index_cast %3 : i32 to index
    %5 = memref.load %arg5[%4] : memref<8xi32, #tpu.memory_space<smem>>
    %c0_i32 = arith.constant 0 : i32
    return %arg0, %arg1, %5 : i32, i32, i32
  }
  func.func @transform_4(%arg0: i32, %arg1: i32, %arg2: i32, %arg3: memref<8xi32, #tpu.memory_space<smem>>, %arg4: memref<8xi32, #tpu.memory_space<smem>>, %arg5: memref<8xi32, #tpu.memory_space<smem>>) -> (i32, i32, i32) {
    %c0_i32 = arith.constant 0 : i32
    %c0_i32_0 = arith.constant 0 : i32
    return %arg0, %arg1, %c0_i32 : i32, i32, i32
  }
}

</mosaic_0001>

<bundles_post_ra>
// kernel: tpu_custom_call.1
= control target key start
LH: loop header
LB: loop body
LE: loop exit
PB: predicated region body
PF: predicated region fallthrough
CT: control target
= control target key end

     0   :  { %s1933_s0 = inlined_call_operand.vmem [shape: s32[8], index: 0, kind: input, shape index: {}]   ;;  %s1934_s3 = inlined_call_operand.vmem [shape: bf16[8,32,32], index: 3, kind: input, shape index: {}]   ;;  %s1935_s4 = inlined_call_operand.vmem [shape: bf16[8,128,32], index: 4, kind: input, shape index: {}]   ;;  %s1936_s5 = inlined_call_operand.vmem [shape: bf16[8,128,128], index: 5, kind: input, shape index: {}]   ;;  %s1937_s6 = inlined_call_operand.hbm [shape: s8[8,32,128], index: 6, kind: input, shape index: {}]   ;;  %s1938_s7 = inlined_call_operand.hbm [shape: f32[8,32,128], index: 7, kind: output, shape index: {}]   ;;  %s1939_s1 = inlined_call_operand.vmem [shape: s32[8], index: 1, kind: input, shape index: {}]   ;;  %s1940_s2 = inlined_call_operand.vmem [shape: s32[8], index: 2, kind: input, shape index: {}]  }
   0x1   :  { %1945 = sst [smem:[#allocation21_spill]] %s1934_s3  ;;  %s12_s26 = sshll.u32 %s1933_s0, 4  ;;  %s13_s26 = int_to_ptr.vmem [resolvable:$true] %s12_s26 }
   0x2   :  { %s16_s29 = sshll.u32 %s1939_s1, 4  ;;  %s1359_s30 = scalar_lea.vmem %s13_s26, 16  ;;  %s17_s29 = int_to_ptr.vmem [resolvable:$true] %s16_s29 }
   0x3   :  { %p1360_p0 = scmp.ne.s32.totalorder %s13_s26, %s1359_s30  ;;  %p1364_p1 = scmp.lt.s32.totalorder %s13_s26, %s13_s26 }
   0x4   :  { %p1365_p2 = scmp.lt.s32.totalorder %s1359_s30, %s1359_s30 }
   0x6   :  { %p1366_p3 = por %p1365_p2, %p1364_p1 }
   0x8   :  { %p1367_p4 = pnand %p1366_p3, %p1360_p0 }
   0xa   :  { %1370 = shalt.err (!%p1367_p4)  }
   0xb   :  { %s1535_s8 = smov [#allocation7]   ;;  %s1371_s9 = scalar_lea.vmem %s17_s29, 16 }
   0xc   :  { %15 = dma.vmem_to_smem %s13_s26, 16, %s1535_s8, [#allocation6] }
   0xd   :  { %p1372_p5 = scmp.ne.s32.totalorder %s17_s29, %s1371_s9  ;;  %p1376_p6 = scmp.lt.s32.totalorder %s17_s29, %s17_s29 }
   0xe   :  { %p1377_p7 = scmp.lt.s32.totalorder %s1371_s9, %s1371_s9 }
  0x10   :  { %p1378_p8 = por %p1377_p7, %p1376_p6 }
  0x12   :  { %p1379_p9 = pnand %p1378_p8, %p1372_p5 }
  0x14   :  { %1382 = shalt.err (!%p1379_p9)  }
  0x15   :  { %s1536_s0 = smov [#allocation8]   ;;  %s20_s11 = sshll.u32 %s1940_s2, 4  ;;  %s21_s11 = int_to_ptr.vmem [resolvable:$true] %s20_s11 }
  0x16   :  { %19 = dma.vmem_to_smem %s17_s29, 16, %s1536_s0, [#allocation6] }
  0x17   :  { %s1383_s12 = scalar_lea.vmem %s21_s11, 16  ;;  %p1388_p11 = scmp.lt.s32.totalorder %s21_s11, %s21_s11 }
  0x18   :  { %p1384_p10 = scmp.ne.s32.totalorder %s21_s11, %s1383_s12  ;;  %p1389_p12 = scmp.lt.s32.totalorder %s1383_s12, %s1383_s12 }
  0x1a   :  { %p1390_p13 = por %p1389_p12, %p1388_p11 }
  0x1c   :  { %p1391_p0 = pnand %p1390_p13, %p1384_p10 }
  0x1e   :  { %1394 = shalt.err (!%p1391_p0)  }
  0x1f   :  { %s1537_s13 = smov [#allocation9]  }
  0x20   :  { %23 = dma.vmem_to_smem %s21_s11, 16, %s1537_s13, [#allocation6] }
  0x21   :  { %1489 = dma.done.wait [#allocation6], 48 }
  0x22   :  { %1490 = vsyncadd [#allocation6], 4294967248 }
  0x23   :  { %25 = sfence }
  0x24   :  { %26 = vsyncpa [#allocation11], 0 }
  0x25   :  { %28 = vsyncpa [#allocation11 + $0x1], 0 }
  0x26   :  { %29 = vsyncpa [#allocation12], 0 }
  0x27   :  { %31 = vsyncpa [#allocation12 + $0x1], 0  ;;  %s1595_s14 = smov 0   ;;  %s1597_s2 = smov 0  }
  0x28   :  { %s1599_s15 = smov 0   ;;  %s1601_s16 = smov 0  }
  0x29   :  { %s1603_s17 = smov 0   ;;  %s1605_s18 = smov 0  }
  0x2a   :  { %s1607_s19 = smov 0   ;;  %s1609_s20 = smov 0  }
  0x2b   :  { %s1611_s21 = smov 0  }
  0x2c LB: > { %s1096_s22 = sadd.s32 4294967295, %s1533_s21   ;;  %s1097_s23 = sadd.s32 4294967294, %s1533_s21   ;;  %s1533_s21 = sphi %s1611_s21, %s37_s21   ;;  %s1529_s20 = sphi %s1609_s20, %s1969_s20   ;;  %s1525_s19 = sphi %s1607_s19, %s1968_s19   ;;  %s1521_s18 = sphi %s1605_s18, %s1967_s18   ;;  %s1517_s17 = sphi %s1603_s17, %s1966_s17   ;;  %s1513_s16 = sphi %s1601_s16, %s1965_s16   ;;  %s1509_s15 = sphi %s1599_s15, %s1964_s15   ;;  %s1505_s2 = sphi %s1597_s2, %s1963_s2   ;;  %s1501_s14 = sphi %s1595_s14, %s1962_s14  }
  0x2d   : > { %s56_s24 = sadd.s32 1, %s1529_s20  ;;  %s158_s25 = sld [smem:[#allocation9 + %s1529_s20]] }
  0x2e   : > { %p58_p1 = scmp.ge.s32.totalorder %s56_s24, 8  ;;  %s169_s26 = sadd.s32 1, %s1521_s18 }
  0x2f   : > { %p176_p2 = scmp.ne.s32.totalorder %s1521_s18, %s1517_s17  ;;  %p177_p3 = scmp.eq.s32.totalorder %s1533_s21, 0 }
  0x30   : > { %s1971_s24 = smov (%p58_p1, %s56_s24), 0  ;;  %p182_p5 = scmp.ne.s32.totalorder %s1517_s17, %s1513_s16 }
  0x31   : > { %1946 = sst [smem:[#allocation19_spill]] %s1971_s24  ;;  %p1648_p4 = por %p177_p3, %p176_p2 }
  0x32   : > { %s161_s28 = sld [smem:[#allocation9 + %s1971_s24]]  ;;  %s162_s29 = ssub.s32 %s1529_s20, %s1971_s24 }
  0x33   : > { %p183_p6 = scmp.eq.s32.totalorder %s1096_s22, 0  ;;  %p195_p7 = scmp.eq.s32.totalorder %s162_s29, 0 }
  0x34   : > { %s197_s30 = sadd.s32 1, %s1509_s15  ;;  %p207_p8 = scmp.ne.s32.totalorder %s1509_s15, %s1505_s2 }
  0x35   : > { %p1659_p9 = por %p183_p6, %p182_p5  ;;  %p208_p10 = scmp.eq.s32.totalorder %s1096_s22, 7 }
  0x36   : > { %s1664_s9 = scalar_select %p195_p7, %s1509_s15, %s197_s30  }
  0x37   : > { %s1948_s8 = scalar_select %p1659_p9, 1, 0 }
  0x38   : > { %p1666_p11 = por %p208_p10, %p207_p8  ;;  %p213_p12 = scmp.ne.s32.totalorder %s1505_s2, %s1501_s14 }
  0x39   : > { %s165_s1 = ssub.s32 %s158_s25, %s161_s28  ;;  %p214_p13 = scmp.eq.s32.totalorder %s1097_s23, 7 }
  0x3a   : > { %s1949_s0 = scalar_select %p1666_p11, 1, 0 }
  0x3b   : > { %s166_s10 = sor.u32 %s165_s1, %s162_s29  ;;  %p1672_p1 = por %p214_p13, %p213_p12 }
  0x3c   : > { %p167_p0 = scmp.eq.s32.totalorder %s166_s10, 0  ;;  %p1232_p2 = scmp.lt.s32.totalorder %s1533_s21, 8 }
  0x3d   : > { %s1950_s11 = scalar_select %p1672_p1, 1, 0 }
  0x3e   : > { %s285_s12 = sand.u32 1, %s1521_s18   ;;  %p1683_p3 = pnand %p1232_p2, %p1648_p4 }
  0x3f   : > { %s1679_s13 = scalar_select %p167_p0, %s1521_s18, %s169_s26  }
  0x40   : > { %s1100_s16 = sshll.u32 %s285_s12, 3  ;;  %p1102_p5 = scmp.ge.s32.totalorder %s1533_s21, 1 }
  0x41   : > { %1951 = sst [smem:[#allocation20_spill]] %s1679_s13  ;;  %p306_p6 = scmp.lt.s32.totalorder %s1533_s21, 9 }
  0x42   : > { %s1216_s25 = scalar_select %p1648_p4, [#allocation9], [#allocation14] }
  0x43   : > { %s1217_s23 = scalar_select %p1648_p4, %s1529_s20, 0 }
  0x44   : > { %s1973_s25 = smov (!%p1232_p2, %s1216_s25), [#allocation15]  ;;  %s289_s29 = scalar_lea.vmem [#allocation10], %s1100_s16 }
  0x45   : > { %s1975_s23 = smov (!%p1232_p2, %s1217_s23), 0  ;;  %s301_s26 = sshll.u32 %s289_s29, 4  ;;  %s1699_s26 = int_to_ptr.vmem [resolvable:$true] %s301_s26 }
  0x46   : > { %s292_s28 = sld [smem:[%s1973_s25 + %s1975_s23]]  ;;  %p1694_p7 = pnand %p1102_p5, %p306_p6 }
  0x47   : > { %s286_s25 = scalar_lea.sflag [#allocation11], %s285_s12  ;;  %p1397_p8 = pneg %p1683_p3 }
  0x48   : > { %s1400_s29 = scalar_lea.hbm %s1937_s6, 1024 }
  0x4c   : > { %s297_s1 = sadd.s32 %s1529_s20, %s292_s28 }
  0x4d   : > { %s1101_s10 = sshll.u32 %s297_s1, 7 }
  0x4e   : > { %s1704_s13 = scalar_lea.hbm %s1937_s6, %s1101_s10 }
  0x4f   : > { %s1395_s16 = scalar_lea.hbm %s1704_s13, 128  ;;  %p1401_p13 = scmp.lt.u32.totalorder %s1704_s13, %s1937_s6 }
  0x50   : > { %p1396_p4 = scmp.ne.s32.totalorder %s1704_s13, %s1395_s16  ;;  %p1402_p0 = scmp.lt.u32.totalorder %s1400_s29, %s1395_s16 }
  0x51   : > { %p1404_p5 = scmp.lt.u32.totalorder %s1395_s16, %s1704_s13 }
  0x52   : > { %p1398_p10 = pnand %p1397_p8, %p1396_p4  ;;  %p1403_p2 = por %p1402_p0, %p1401_p13 }
  0x54   : > { %p1399_p12 = pneg %p1398_p10  ;;  %p1405_p6 = por %p1404_p5, %p1403_p2 }
  0x56   : > { %p1406_p1 = pnand %p1405_p6, %p1399_p12 }
  0x58   : > { %1409 = shalt.err (!%p1406_p1)
}
  0x59   : > { %s1410_s12 = scalar_lea.vmem %s1699_s26, 128  ;;  %s1538_s10 = smov [#allocation10]  }
  0x5a   : > { %p1411_p4 = scmp.ne.s32.totalorder %s1699_s26, %s1410_s12  ;;  %s1415_s27 = sshll.u32 %s1538_s10, 4  ;;  %s1416_s27 = int_to_ptr.vmem [resolvable:$false] %s1415_s27 }
  0x5b   : > { %s1417_s23 = scalar_lea.vmem %s1416_s27, 256  ;;  %p1418_p9 = scmp.lt.s32.totalorder %s1699_s26, %s1416_s27 }
  0x5c   : > { %p1413_p10 = pnand %p1411_p4, %p1397_p8  ;;  %p1419_p13 = scmp.lt.s32.totalorder %s1417_s23, %s1410_s12 }
  0x5e   : > { %p1414_p11 = pneg %p1413_p10  ;;  %p1420_p0 = por %p1419_p13, %p1418_p9 }
  0x60   : > { %p1421_p2 = pnand %p1420_p0, %p1414_p11 }
  0x62   : > { %1424 = shalt.err (!%p1421_p2)
}
  0x63   : > { %1227 = dma.hbm_to_vmem [thread:$0]  (!%p1683_p3), %s1704_s13, 128, %s1699_s26, %s286_s25  }
  0x64   : > { %310 = sbr.rel (%p1694_p7) target bundleno = 1082 (0x43a), region = 36  ;;  %s312_s16 = sand.u32 (!%p1694_p7), 1, %s1517_s17  }
  0x65   : > { %s1734_s28 = sshll.u32 (!%p1694_p7), %s312_s16, 3  ;;  %s313_s29 = scalar_lea.sflag (!%p1694_p7), [#allocation11], %s312_s16 }
  0x66   : > { %p1954_p1 = scmp.ne.s32.totalorder (!%p1694_p7), %s1948_s8, 0 }
  0x6b   : > { %1492 = dma.done.wait (%p1954_p1), %s313_s29, 128  }
  0x6c   : > { %1494 = vsyncadd (%p1954_p1), %s313_s29, 4294967168  ;;  %s1944_s13 = sand.u32 1, %s1505_s2   ;;  %p375_p9 = scmp.lt.s32.totalorder %s1525_s19, 7  ;;  %vm447_vm0 = vcmask 7168   ;;  %v1539_v0 = vmov 0.0   ;;  %vm444_vm1 = vcmask 261120  }
  0x6d   : > { %s1744_s22 = sld [smem:[#allocation7 + %s1525_s19]]  ;;  %s1748_s26 = sshll.u32 %s1944_s13, 5  ;;  %452 = vst.msk [vmem:[#allocation4] sm:$0xff] %vm447_vm0, %v1539_v0  ;;  %453 = vst.msk [vmem:[#allocation4 + $0x8] sm:$0xff] %vm447_vm0, %v1539_v0  ;;  %v1540_v1 = vmov -2.3819763e+38  }
  0x6e   : > { %454 = vst.msk [vmem:[#allocation4 + $0x10] sm:$0xff] %vm447_vm0, %v1539_v0  ;;  %455 = vst.msk [vmem:[#allocation4 + $0x18] sm:$0xff] %vm447_vm0, %v1539_v0  ;;  %s386_s8 = sld [smem:[#allocation8 + %s1525_s19]] }
  0x6f   : > { %456 = vst [vmem:[#allocation5] sm:$0xff] %v1539_v0  ;;  %457 = vst [vmem:[#allocation5 + $0x8] sm:$0xff] %v1539_v0  ;;  %s376_s30 = scalar_select %p375_p9, %s1525_s19, 7 }
  0x70   : > { %458 = vst [vmem:[#allocation5 + $0x10] sm:$0xff] %v1539_v0  ;;  %459 = vst [vmem:[#allocation5 + $0x18] sm:$0xff] %v1539_v0  ;;  %s402_s25 = sld [smem:[#allocation8 + %s1525_s19]] }
  0x71   : > { %448 = vst.msk [vmem:[#allocation3] sm:$0xff] %vm447_vm0, %v1540_v1  ;;  %449 = vst.msk [vmem:[#allocation3 + $0x8] sm:$0xff] %vm447_vm0, %v1540_v1  ;;  %s1137_s1 = sshll.u32 %s376_s30, 4  ;;  %s1955_s3 = sld [smem:[#allocation21_spill]] }
  0x72   : > { %450 = vst.msk [vmem:[#allocation3 + $0x10] sm:$0xff] %vm447_vm0, %v1540_v1  ;;  %451 = vst.msk [vmem:[#allocation3 + $0x18] sm:$0xff] %vm447_vm0, %v1540_v1 }
  0x73   : > { %p1113_p7 = scmp.le.s32.totalorder %s1744_s22, 0 }
  0x74   : > { %s1107_s23 = sshll.u32 %s386_s8, 4  ;;  %v1541_v32 = vmov (!%p1113_p7), 0   ;;  %p604_p8 = scmp.eq.s32.totalorder (!%p1113_p7), %s1744_s22, 2 }
  0x75   : > { %p390_p11 = scmp.lt.s32.totalorder %s1107_s23, 15  ;;  %1316 = vset.pattern.permute.xlu1 (!%p1113_p7), %v1541_v32  ;;  %1315 = vset.pattern.permute.xlu0 (!%p1113_p7), %v1541_v32  ;;  %s1956_s13 = scalar_lea.vmem (!%p1113_p7), [#allocation10], %s1734_s28 }
  0x76   : > { %s1110_s16 = sshll.u32 %s402_s25, 4  ;;  %v602_v33 = vld [vmem:[%s1956_s13] sm:$0xff] (!%p1113_p7) }
  0x77   : > { %s382_s27 = scalar_lea.vmem %s1955_s3, %s1137_s1  ;;  %s1977_s23 = smov (!%p390_p11, %s1107_s23), 15  ;;  %vm603_vm2 = vnez (!%p1113_p7), %v602_v33 }
  0x78   : > { %v1140_v2 = vld [vmem:[%s382_s27] sm:$0xff]   ;;  %v1147_v3 = vld [vmem:[%s382_s27 + $0x8] sm:$0xff]   ;;  %p406_p3 = scmp.lt.s32.totalorder %s1110_s16, 15  ;;  %s393_s29 = sadd.s32 %s1137_s1, %s1977_s23 }
  0x79   : > { %v1141_v4 = vunpack.c.l.bf16 %v1140_v2  ;;  %v1142_v5 = vunpack.c.h.bf16 %v1140_v2  ;;  %v1145_v6 = vunpack.c.l.bf16 %v1147_v3  ;;  %v1146_v7 = vunpack.c.h.bf16 %v1147_v3  ;;  %s1109_s30 = sshll.u32 %s393_s29, 2  ;;  %s1779_s23 = scalar_lea.vmem [#allocation13], %s1748_s26  ;;  %v1825_v2 = vld [vmem:[#allocation3 + $0x10] sm:$0xff] (!%p1113_p7)  ;;  %v658_v3 = vld [vmem:[#allocation3] sm:$0xff] (!%p1113_p7) }
  0x7a   : > { %s1770_s10 = scalar_lea.vmem %s1935_s4, %s1109_s30  ;;  %s1979_s16 = smov (!%p406_p3, %s1110_s16), 15 }
  0x7b   : > { %v438_v8 = vmul.f32 0.17677669, %v1141_v4  ;;  %v439_v9 = vmul.f32 0.17677669, %v1142_v5  ;;  %v440_v10 = vmul.f32 0.17677669, %v1145_v6  ;;  %s409_s25 = sadd.s32 %s1137_s1, %s1979_s16 }
  0x7c   : > { %v441_v11 = vmul.f32 0.17677669, %v1146_v7  ;;  %s1112_s27 = sshll.u32 %s409_s25, 2  ;;  %463 = sbr.rel (%p1113_p7) target bundleno = 918 (0x396), region = 48  ;;  %v1317_v14 = vld [vmem:[%s1770_s10] sm:$0xff] (!%p1113_p7)   ;;  %v1318_v15 = vld [vmem:[%s1770_s10 + $0x8] sm:$0xff] (!%p1113_p7)  }
  0x7d   : > { %v442_v12 = vpack.c.bf16 %v439_v9, %v438_v8  ;;  %s1776_s3 = scalar_lea.vmem %s1936_s5, %s1112_s27  ;;  %1208 = vmatprep.subr.msk.bf16.mxu0 (!%p1113_p7), %vm444_vm1, %v1317_v14  ;;  %v530_v16 = vsel (!%p1113_p7), %vm444_vm1, %v1317_v14, 0  ;;  %v533_v17 = vsel (!%p1113_p7), %vm444_vm1, %v1318_v15, 0  ;;  %v1319_v18 = vld [vmem:[%s1770_s10 + $0x10] sm:$0xff] (!%p1113_p7)   ;;  %v1320_v21 = vld [vmem:[%s1770_s10 + $0x18] sm:$0xff] (!%p1113_p7)   ;;  %v1321_v23 = vld [vmem:[%s1770_s10 + $0x20] sm:$0xff] (!%p1113_p7)  }
  0x7e   : > { %v443_v13 = vpack.c.bf16 %v441_v11, %v440_v10  ;;  %1169 = vmatpush3.bf16.xpose.msra.mxu0 (!%p1113_p7), %v530_v16  ;;  %v536_v20 = vsel (!%p1113_p7), %vm444_vm1, %v1319_v18, 0  ;;  %v539_v22 = vsel (!%p1113_p7), %vm444_vm1, %v1320_v21, 0  ;;  %v542_v24 = vsel (!%p1113_p7), %vm444_vm1, %v1321_v23, 0  ;;  %v1322_v25 = vld [vmem:[%s1770_s10 + $0x28] sm:$0xff] (!%p1113_p7)   ;;  %v1323_v27 = vld [vmem:[%s1770_s10 + $0x30] sm:$0xff] (!%p1113_p7)   ;;  %v1324_v29 = vld [vmem:[%s1770_s10 + $0x38] sm:$0xff] (!%p1113_p7)  }
  0x7f   : > { %445 = vst.msk [vmem:[#allocation2] sm:$0xff] %vm444_vm1, %v442_v12  ;;  %1209 = vmatprep.subr.msk.bf16.mxu0 (!%p1113_p7), %vm444_vm1, %v1318_v15  ;;  %v545_v26 = vsel (!%p1113_p7), %vm444_vm1, %v1322_v25, 0  ;;  %v548_v28 = vsel (!%p1113_p7), %vm444_vm1, %v1323_v27, 0  ;;  %v551_v30 = vsel (!%p1113_p7), %vm444_vm1, %v1324_v29, 0  ;;  %v1325_v0 = vld [vmem:[%s1776_s3] sm:$0xff] (!%p1113_p7)   ;;  %v1326_v1 = vld [vmem:[%s1776_s3 + $0x8] sm:$0xff] (!%p1113_p7)  }
  0x80   : > { %446 = vst.msk [vmem:[#allocation2 + $0x8] sm:$0xff] %vm444_vm1, %v443_v13  ;;  %1188 = vmatprep.subr.bf16.mxu1 (!%p1113_p7), %v1325_v0  ;;  %v1830_v8 = vld [vmem:[#allocation3 + $0x18] sm:$0xff] (!%p1113_p7)  ;;  %v1837_v10 = vld [vmem:[#allocation3 + $0x8] sm:$0xff] (!%p1113_p7)  ;;  %v1327_v11 = vld [vmem:[%s1776_s3 + $0x10] sm:$0xff] (!%p1113_p7)  }
  0x81   : > { %1189 = vmatpush3.bf16.msra.mxu1 (!%p1113_p7), %v1325_v0 }
  0x82   : > { %1190 = vmatprep.subr.bf16.mxu1 (!%p1113_p7), %v1326_v1 }
  0x83   : > { %s605_s24 = scalar_select %p604_p8, 1, 0 }
  0x85   : > { %v606_v34 = vstv %s605_s24  ;;  %1191 = vmatpush3.bf16.msra.mxu1 %v1326_v1 }
  0x86   : > { %v464_v19 = vld [vmem:[#allocation2] sm:$0xff]  ;;  %1171 = vmatpush3.bf16.xpose.msra.mxu0 %v533_v17  ;;  %vm607_vm3 = vcmp.eq.s32.totalorder %v606_v34, 1  ;;  %1192 = vmatprep.subr.bf16.mxu1 %v1327_v11 }
  0x87   : > { %1184 = vmatprep.mubr.msk.bf16.mxu0 %vm444_vm1, %v464_v19  ;;  %1210 = vmatprep.subr.msk.bf16.mxu0 %vm444_vm1, %v1319_v18  ;;  %v465_v31 = vld [vmem:[#allocation2 + $0x8] sm:$0xff]  ;;  %vm608_vm4 = vmor %vm603_vm2, %vm607_vm3  ;;  %v1328_v19 = vld [vmem:[%s1776_s3 + $0x18] sm:$0xff]  }
  0x88   : > { %v609_v35 = vsel %vm608_vm4, 16843009, %v1541_v32 }
  0x89   : > { %v612_v36 = vunpack.c.2.s8 %v609_v35  ;;  %v610_v37 = vunpack.c.0.s8 %v609_v35  ;;  %v613_v38 = vunpack.c.3.s8 %v609_v35  ;;  %v611_v39 = vunpack.c.1.s8 %v609_v35  ;;  %1193 = vmatpush3.bf16.msra.mxu1 %v1327_v11 }
  0x8a   : > { %1194 = vmatprep.subr.bf16.mxu1 %v1328_v19 }
  0x8b   : > { %v618_v40 = vpack.c.b16 %v612_v36, %v612_v36  ;;  %v614_v41 = vpack.c.b16 %v610_v37, %v610_v37  ;;  %v620_v42 = vpack.c.b16 %v613_v38, %v613_v38  ;;  %v616_v43 = vpack.c.b16 %v611_v39, %v611_v39 }
  0x8d   : > { %v619_v44 = vpack.c.b8 %v618_v40, %v618_v40  ;;  %v615_v45 = vpack.c.b8 %v614_v41, %v614_v41  ;;  %v621_v46 = vpack.c.b8 %v620_v42, %v620_v42  ;;  %v617_v47 = vpack.c.b8 %v616_v43, %v616_v43  ;;  %1195 = vmatpush3.bf16.msra.mxu1 %v1328_v19 }
  0x8e   : > { %1173 = vmatpush3.bf16.xpose.msra.mxu0 %v536_v20 }
  0x8f   : > { %1211 = vmatprep.subr.msk.bf16.mxu0 %vm444_vm1, %v1320_v21  ;;  %vm624_vm5 = vnez %v619_v44  ;;  %vm622_vm6 = vnez %v615_v45  ;;  %vm625_vm7 = vnez %v621_v46  ;;  %vm623_vm8 = vnez %v617_v47  ;;  %v1329_v21 = vld [vmem:[%s1776_s3 + $0x20] sm:$0xff]  }
  0x90   : > { %v628_v48 = vsel %vm624_vm5, 16843009, %v1541_v32  ;;  %v626_v49 = vsel %vm622_vm6, 16843009, %v1541_v32  ;;  %v629_v50 = vsel %vm625_vm7, 16843009, %v1541_v32  ;;  %1196 = vmatprep.subr.bf16.mxu1 %v1329_v21 }
  0x91   : > { %v632_v51 = vunpack.c.0.s8 %v628_v48  ;;  %v627_v52 = vsel %vm623_vm8, 16843009, %v1541_v32  ;;  %v630_v53 = vunpack.c.0.s8 %v626_v49  ;;  %v633_v54 = vunpack.c.0.s8 %v629_v50  ;;  %1197 = vmatpush3.bf16.msra.mxu1 %v1329_v21 }
  0x92   : > { %v631_v55 = vunpack.c.0.s8 %v627_v52 }
  0x93   : > { %vm636_vm9 = vcmp.ne.s32.totalorder %v632_v51, 0  ;;  %vm634_vm10 = vcmp.ne.s32.totalorder %v630_v53, 0  ;;  %vm637_vm11 = vcmp.ne.s32.totalorder %v633_v54, 0  ;;  %v720_v51 = vld [vmem:[#allocation4 + $0x10] sm:$0xff]  ;;  %v718_v54 = vld [vmem:[#allocation4] sm:$0xff] }
  0x94   : > { %vm635_vm12 = vcmp.ne.s32.totalorder %v631_v55, 0 }
  0x96   : > { %1175 = vmatpush3.bf16.xpose.msra.mxu0 %v539_v22  ;;  %v1330_v22 = vld [vmem:[%s1776_s3 + $0x28] sm:$0xff]  }
  0x97   : > { %1212 = vmatprep.subr.msk.bf16.mxu0 %vm444_vm1, %v1321_v23  ;;  %1198 = vmatprep.subr.bf16.mxu1 %v1330_v22 }
  0x98   : > { %1199 = vmatpush3.bf16.msra.mxu1 %v1330_v22 }
  0x9e   : > { %1177 = vmatpush3.bf16.xpose.msra.mxu0 %v542_v24  ;;  %v1331_v24 = vld [vmem:[%s1776_s3 + $0x30] sm:$0xff]  }
  0x9f   : > { %1213 = vmatprep.subr.msk.bf16.mxu0 %vm444_vm1, %v1322_v25  ;;  %1200 = vmatprep.subr.bf16.mxu1 %v1331_v24  ;;  %v1332_v25 = vld [vmem:[%s1776_s3 + $0x38] sm:$0xff]  }
  0xa0   : > { %1201 = vmatpush3.bf16.msra.mxu1 %v1331_v24 }
  0xa1   : > { %1202 = vmatprep.subr.bf16.mxu1 %v1332_v25 }
  0xa4   : > { %1203 = vmatpush3.bf16.msra.mxu1 %v1332_v25 }
  0xa6   : > { %1179 = vmatpush3.bf16.xpose.msra.mxu0 %v545_v26 }
  0xa7   : > { %1214 = vmatprep.subr.msk.bf16.mxu0 %vm444_vm1, %v1323_v27 }
  0xae   : > { %1181 = vmatpush3.bf16.xpose.msra.mxu0 %v548_v28 }
  0xaf   : > { %1215 = vmatprep.subr.msk.bf16.mxu0 %vm444_vm1, %v1324_v29 }
  0xb6   : > { %1183 = vmatpush3.bf16.xpose.msra.mxu0 %v551_v30 }
  0xbd   : > { %1185 = vmatmul.mubr.msk.bf16.vlgmr.msra.gmra.mrb[0].mxu0 %vm444_vm1, %v465_v31 }
 0x190   : > { %v1186_v56 = vpop.f32.mrb[0].mxu0 }
 0x191   : > { %v587_v57 = vpop.f32.mrb[1].mxu0  ;;  %v1811_v58 = vsel %vm636_vm9, %v1186_v56, -2.3819763e+38  ;;  %v719_v56 = vld [vmem:[#allocation4 + $0x8] sm:$0xff] }
 0x192   : > { %666 = vmax.xlane.f32.xlu1 %v1811_v58  ;;  %v1187_v59 = vpop.f32.mrb[2].mxu0  ;;  %v1814_v60 = vsel %vm634_vm10, %v587_v57, -2.3819763e+38 }
 0x193   : > { %662 = vmax.xlane.f32.xlu0 %v1814_v60  ;;  %v590_v61 = vpop.f32.mrb[3].mxu0  ;;  %v1817_v62 = vsel %vm637_vm11, %v1187_v59, -2.3819763e+38 }
 0x194   : > { %v1819_v63 = vsel %vm635_vm12, %v590_v61, -2.3819763e+38 }
 0x196   : > { %668 = vmax.xlane.f32.xlu1 %v1817_v62 }
 0x197   : > { %664 = vmax.xlane.f32.xlu0 %v1819_v63 }
 0x21f   : > { %v667_v4 = vpop.xlane.xlu1 %666 }
 0x220   : > { %v1828_v5 = vmax.f32 %v1825_v2, %v667_v4  ;;  %v663_v6 = vpop.xlane.xlu0 %662  ;;  %v745_v4 = vld [vmem:[#allocation5 + $0x10] sm:$0xff] }
 0x221   : > { %v670_v7 = vmax.f32 %v658_v3, %v663_v6  ;;  %v746_v6 = vld [vmem:[#allocation5 + $0x18] sm:$0xff] }
 0x222   : > { %v676_v9 = vsub.f32 %v1825_v2, %v1828_v5  ;;  %880 = vst.msk [vmem:[#allocation3 + $0x10] sm:$0xff] %vm447_vm0, %v1828_v5  ;;  %698 = vperm.xlu1 %1316, %v1828_v5   ;;  %v743_v5 = vld [vmem:[#allocation5] sm:$0xff] }
 0x223   : > { %v674_v12 = vsub.f32 %v658_v3, %v670_v7  ;;  %878 = vst.msk [vmem:[#allocation3] sm:$0xff] %vm447_vm0, %v670_v7  ;;  %v669_v13 = vpop.xlane.xlu1 %668  ;;  %688 = vperm.xlu0 %1315, %v670_v7  }
 0x224   : > { %v673_v14 = vmax.f32 %v1830_v8, %v669_v13  ;;  %v665_v15 = vpop.xlane.xlu0 %664  ;;  %v682_v44 = vmul.f32 1.442695, %v676_v9  ;;  %v744_v9 = vld [vmem:[#allocation5 + $0x8] sm:$0xff] }
 0x225   : > { %v678_v16 = vmul.f32 1.442695, %v674_v12  ;;  %v671_v17 = vmax.f32 %v1837_v10, %v665_v15 }
 0x226   : > { %v677_v18 = vsub.f32 %v1830_v8, %v673_v14  ;;  %881 = vst.msk [vmem:[#allocation3 + $0x18] sm:$0xff] %vm447_vm0, %v673_v14 }
 0x227   : > { %1333 = vpow2.f32 %v678_v16  ;;  %v675_v20 = vsub.f32 %v1837_v10, %v671_v17  ;;  %879 = vst.msk [vmem:[#allocation3 + $0x8] sm:$0xff] %vm447_vm0, %v671_v17  ;;  %693 = vperm.xlu1 %1316, %v671_v17  }
 0x228   : > { %v684_v46 = vmul.f32 1.442695, %v677_v18 }
 0x229   : > { %v680_v45 = vmul.f32 1.442695, %v675_v20 }
 0x22b   : > { %703 = vperm.xlu1 %1316, %v673_v14  }
 0x231   : > { %v1334_v23 = vpop.eup %1333 }
 0x232   : > { %749 = vperm.xlu1 %1316, %v1334_v23   ;;  %v722_v57 = vmul.f32 %v1334_v23, %v718_v54 }
 0x2a1   : > { %v699_v26 = vpop.permute.xlu1 %698 }
 0x2a2   : > { %v708_v27 = vsub.f32 %v1811_v58, %v699_v26  ;;  %v689_v28 = vpop.permute.xlu0 %688 }
 0x2a3   : > { %v706_v29 = vsub.f32 %v1814_v60, %v689_v28 }
 0x2a4   : > { %v714_v30 = vmul.f32 1.442695, %v708_v27 }
 0x2a5   : > { %v710_v31 = vmul.f32 1.442695, %v706_v29 }
 0x2a6   : > { %1335 = vpow2.f32 %v714_v30  ;;  %v694_v32 = vpop.permute.xlu1 %693 }
 0x2a7   : > { %v707_v33 = vsub.f32 %v1819_v63, %v694_v32  ;;  %1337 = vpow2.f32 %v710_v31 }
 0x2a9   : > { %v712_v34 = vmul.f32 1.442695, %v707_v33 }
 0x2aa   : > { %v704_v35 = vpop.permute.xlu1 %703 }
 0x2ab   : > { %1339 = vpow2.f32 %v712_v34  ;;  %v709_v36 = vsub.f32 %v1817_v62, %v704_v35  ;;  %v721_v62 = vld [vmem:[#allocation4 + $0x18] sm:$0xff] }
 0x2ad   : > { %v716_v37 = vmul.f32 1.442695, %v709_v36 }
 0x2af   : > { %1341 = vpow2.f32 %v716_v37 }
 0x2b0   : > { %v1336_v38 = vpop.eup %1335  ;;  %1343 = vpow2.f32 %v682_v44 }
 0x2b1   : > { %730 = vadd.xlane.f32.xlu1 %v1336_v38  ;;  %v1338_v39 = vpop.eup %1337  ;;  %1345 = vpow2.f32 %v680_v45  ;;  %v750_v50 = vpop.permute.xlu1 %749 }
 0x2b2   : > { %1347 = vpow2.f32 %v684_v46  ;;  %v767_v11 = vmul.f32 %v750_v50, %v743_v5 }
 0x2b5   : > { %v1340_v40 = vpop.eup %1339  ;;  %726 = vadd.xlane.f32.xlu1 %v1338_v39 }
 0x2b6   : > { %728 = vadd.xlane.f32.xlu0 %v1340_v40  ;;  %v771_v41 = vpack.c.bf16 %v1340_v40, %v1338_v39 }
 0x2b8   : > { %1204 = vmatprep.mubr.bf16.mxu1 %v771_v41 }
 0x2b9   : > { %v1342_v42 = vpop.eup %1341 }
 0x2ba   : > { %732 = vadd.xlane.f32.xlu1 %v1342_v42  ;;  %v772_v43 = vpack.c.bf16 %v1342_v42, %v1336_v38  ;;  %v1344_v47 = vpop.eup %1343 }
 0x2bb   : > { %v1346_v48 = vpop.eup %1345  ;;  %v724_v52 = vmul.f32 %v1344_v47, %v720_v51 }
 0x2bc   : > { %1205 = vmatmul.mubr.bf16.vlgmr.msra.gmra.mrb[0].mxu1 %v772_v43  ;;  %v1348_v49 = vpop.eup %1347  ;;  %v723_v59 = vmul.f32 %v1346_v48, %v719_v56 }
 0x2bd   : > { %v725_v0 = vmul.f32 %v1348_v49, %v721_v62 }
 0x2cb   : > { %759 = vperm.xlu1 %1316, %v1344_v47  }
 0x2cc   : > { %754 = vperm.xlu0 %1315, %v1346_v48  }
 0x2cf   : > { %764 = vperm.xlu1 %1316, %v1348_v49  }
 0x33e   : > { %v731_v53 = vpop.xlane.xlu1 %730 }
 0x33f   : > { %v736_v55 = vadd.f32 %v731_v53, %v724_v52 }
 0x341   : > { %741 = vst.msk [vmem:[#allocation4 + $0x10] sm:$0xff] %vm447_vm0, %v736_v55 }
 0x342   : > { %v727_v58 = vpop.xlane.xlu1 %726 }
 0x343   : > { %v734_v60 = vadd.f32 %v727_v58, %v722_v57  ;;  %v729_v61 = vpop.xlane.xlu0 %728 }
 0x344   : > { %v735_v63 = vadd.f32 %v729_v61, %v723_v59 }
 0x345   : > { %739 = vst.msk [vmem:[#allocation4] sm:$0xff] %vm447_vm0, %v734_v60 }
 0x346   : > { %740 = vst.msk [vmem:[#allocation4 + $0x8] sm:$0xff] %vm447_vm0, %v735_v63 }
 0x347   : > { %v733_v1 = vpop.xlane.xlu1 %732 }
 0x348   : > { %v737_v2 = vadd.f32 %v733_v1, %v725_v0 }
 0x34a   : > { %742 = vst.msk [vmem:[#allocation4 + $0x18] sm:$0xff] %vm447_vm0, %v737_v2 }
 0x34b   : > { %v760_v3 = vpop.permute.xlu1 %759  ;;  %v755_v10 = vpop.permute.xlu0 %754 }
 0x34c   : > { %v769_v8 = vmul.f32 %v760_v3, %v745_v4  ;;  %v768_v16 = vmul.f32 %v755_v10, %v744_v9 }
 0x34f   : > { %v765_v7 = vpop.permute.xlu1 %764 }
 0x350   : > { %v770_v13 = vmul.f32 %v765_v7, %v746_v6 }
 0x38f   : > { %v1206_v12 = vpop.f32.mrb[0].mxu1 }
 0x390   : > { %v872_v14 = vadd.f32 %v1206_v12, %v769_v8  ;;  %v855_v15 = vpop.f32.mrb[1].mxu1 }
 0x391   : > { %v870_v17 = vadd.f32 %v855_v15, %v767_v11  ;;  %v1207_v18 = vpop.f32.mrb[2].mxu1 }
 0x392   : > { %876 = vst [vmem:[#allocation5 + $0x10] sm:$0xff] %v872_v14  ;;  %v873_v19 = vadd.f32 %v1207_v18, %v770_v13  ;;  %v858_v20 = vpop.f32.mrb[3].mxu1 }
 0x393   : > { %874 = vst [vmem:[#allocation5] sm:$0xff] %v870_v17  ;;  %v871_v21 = vadd.f32 %v858_v20, %v768_v16 }
 0x394   : > { %877 = vst [vmem:[#allocation5 + $0x18] sm:$0xff] %v873_v19 }
 0x395   : > { %875 = vst [vmem:[#allocation5 + $0x8] sm:$0xff] %v871_v21 }
 0x396 PF: > { %v887_v22 = vld [vmem:[#allocation4 + $0x10] sm:$0xff]  ;;  %v885_v23 = vld [vmem:[#allocation4] sm:$0xff]  ;;  %v888_v24 = vld [vmem:[#allocation4 + $0x18] sm:$0xff]  ;;  %v1542_v25 = vmov 0   ;;  %s1138_s3 = sshll.u32 %s1525_s19, 9  ;;  %s953_s28 = sshll.u32 %s1779_s23, 4  ;;  %s1872_s28 = int_to_ptr.vmem [resolvable:$true] %s953_s28 }
 0x397   : > { %1350 = vset.pattern.permute.xlu1 %v1542_v25  ;;  %1349 = vset.pattern.permute.xlu0 %v1542_v25  ;;  %vm891_vm13 = vcmp.eq.f32.partialorder %v887_v22, 0.0  ;;  %vm889_vm14 = vcmp.eq.f32.partialorder %v885_v23, 0.0  ;;  %vm892_vm15 = vcmp.eq.f32.partialorder %v888_v24, 0.0  ;;  %v886_v26 = vld [vmem:[#allocation4 + $0x8] sm:$0xff]  ;;  %s1870_s1 = scalar_lea.hbm %s1938_s7, %s1138_s3  ;;  %s1957_s19 = sand.u32 1, %s1505_s2  }
 0x398   : > { %v895_v27 = vsel %vm891_vm13, 1.0, %v887_v22  ;;  %v893_v28 = vsel %vm889_vm14, 1.0, %v885_v23  ;;  %v896_v29 = vsel %vm892_vm15, 1.0, %v888_v24  ;;  %vm890_vm0 = vcmp.eq.f32.partialorder %v886_v26, 0.0  ;;  %s1878_s16 = scalar_lea.sflag [#allocation12], %s1957_s19  ;;  %s1425_s29 = scalar_lea.vmem %s1872_s28, 512 }
 0x399   : > { %1351 = vrcp.f32 %v895_v27  ;;  %v894_v30 = vsel %vm890_vm0, 1.0, %v886_v26  ;;  %v907_v35 = vld [vmem:[#allocation5 + $0x10] sm:$0xff]  ;;  %p1426_p12 = scmp.ne.s32.totalorder %s1872_s28, %s1425_s29  ;;  %p1958_p5 = scmp.ne.s32.totalorder %s1949_s0, 0 }
 0x39a   : > { %1353 = vrcp.f32 %v893_v28  ;;  %v905_v36 = vld [vmem:[#allocation5] sm:$0xff]  ;;  %s1543_s30 = smov [#allocation13]  }
 0x39b   : > { %1355 = vrcp.f32 %v896_v29  ;;  %v908_v41 = vld [vmem:[#allocation5 + $0x18] sm:$0xff]  ;;  %p1427_p6 = pnand %p1426_p12, %p1958_p5  ;;  %s1429_s8 = sshll.u32 %s1543_s30, 4  ;;  %s1430_s8 = int_to_ptr.vmem [resolvable:$false] %s1429_s8 }
 0x39c   : > { %1357 = vrcp.f32 %v894_v30  ;;  %v906_v42 = vld [vmem:[#allocation5 + $0x8] sm:$0xff]  ;;  %s1431_s12 = scalar_lea.vmem %s1430_s8, 1024  ;;  %p1432_p10 = scmp.lt.s32.totalorder %s1872_s28, %s1430_s8 }
 0x39d   : > { %p1428_p4 = pneg %p1427_p6  ;;  %p1433_p13 = scmp.lt.s32.totalorder %s1431_s12, %s1425_s29 }
 0x39f   : > { %p1434_p0 = por %p1433_p13, %p1432_p10 }
 0x3a1   : > { %p1435_p2 = pnand %p1434_p0, %p1428_p4 }
 0x3a3   : > { %v1352_v31 = vpop.eup %1351 }
 0x3a4   : > { %v1354_v32 = vpop.eup %1353  ;;  %921 = vperm.xlu1 %1350, %v1352_v31  }
 0x3a5   : > { %v1356_v33 = vpop.eup %1355  ;;  %911 = vperm.xlu0 %1349, %v1354_v32  }
 0x3a6   : > { %v1358_v34 = vpop.eup %1357 }
 0x3a8   : > { %926 = vperm.xlu1 %1350, %v1356_v33  }
 0x3a9   : > { %916 = vperm.xlu0 %1349, %v1358_v34  }
 0x423   : > { %v922_v37 = vpop.permute.xlu1 %921 }
 0x424   : > { %v931_v38 = vmul.f32 %v922_v37, %v907_v35  ;;  %v912_v39 = vpop.permute.xlu0 %911 }
 0x425   : > { %v929_v40 = vmul.f32 %v912_v39, %v905_v36 }
 0x426   : > { %935 = vst [vmem:[%s1779_s23 + $0x10] sm:$0xff] %v931_v38 }
 0x427   : > { %933 = vst [vmem:[%s1779_s23] sm:$0xff] %v929_v40  ;;  %v927_v43 = vpop.permute.xlu1 %926 }
 0x428   : > { %v932_v44 = vmul.f32 %v927_v43, %v908_v41  ;;  %v917_v45 = vpop.permute.xlu0 %916 }
 0x429   : > { %v930_v46 = vmul.f32 %v917_v45, %v906_v42 }
 0x42a   : > { %936 = vst [vmem:[%s1779_s23 + $0x18] sm:$0xff] %v932_v44 }
 0x42b   : > { %934 = vst [vmem:[%s1779_s23 + $0x8] sm:$0xff] %v930_v46 }
 0x42c   : > { %1438 = shalt.err (!%p1435_p2)
}
 0x42d   : > { %s1439_s10 = scalar_lea.hbm %s1870_s1, 512  ;;  %s1443_s23 = scalar_lea.hbm %s1938_s7, 4096 }
 0x42e   : > { %p1440_p1 = scmp.ne.s32.totalorder %s1870_s1, %s1439_s10  ;;  %p1444_p3 = scmp.lt.u32.totalorder %s1870_s1, %s1938_s7 }
 0x42f   : > { %p1445_p7 = scmp.lt.u32.totalorder %s1443_s23, %s1439_s10  ;;  %p1447_p12 = scmp.lt.u32.totalorder %s1439_s10, %s1870_s1 }
 0x430   : > { %p1441_p9 = pnand %p1440_p1, %p1958_p5 }
 0x431   : > { %p1446_p8 = por %p1445_p7, %p1444_p3 }
 0x432   : > { %p1442_p11 = pneg %p1441_p9 }
 0x433   : > { %p1448_p6 = por %p1447_p12, %p1446_p8 }
 0x435   : > { %p1449_p4 = pnand %p1448_p6, %p1442_p11 }
 0x437   : > { %1452 = shalt.err (!%p1449_p4)
}
 0x438   : > { %s1544_s3 = smov 128   ;;  %s1545_s22 = smov 8  }
 0x439   : > { %1220 = dma.vmem_to_hbm [thread:$0]  (%p1958_p5), %s1872_s28, 512, %s1870_s1, %s1878_s16, %s1544_s3, %s1544_s3, %s1545_s22  }
 0x43a PF: > { %p1233_p10 = scmp.ge.s32.totalorder %s1533_s21, 2  ;;  %s968_s26 = sand.u32 1, %s1501_s14  }
 0x43b   : > { %p1959_p13 = scmp.ne.s32.totalorder %s1950_s11, 0  ;;  %s969_s19 = scalar_lea.sflag [#allocation12], %s968_s26 }
 0x43d   : > { %p1229_p0 = pnand %p1233_p10, %p1959_p13 }
 0x43f   : > { %1496 = dma.done.wait (!%p1229_p0), %s969_s19, 512  }
 0x440   : > { %1498 = vsyncadd (!%p1229_p0), %s969_s19, 4294966784  ;;  %s37_s21 = sadd.s32 1, %s1533_s21   ;;  %s1960_s0 = sld [smem:[#allocation20_spill]] }
 0x441   : > { %p34_p2 = scmp.ge.s32.totalorder %s37_s21, 10   ;;  %s1961_s28 = sld [smem:[#allocation19_spill]] }
 0x442   : > { %s1962_s14 = smov %s1505_s2  ;;  %s1963_s2 = smov %s1509_s15 }
 0x443   : > { %s1964_s15 = smov %s1664_s9  ;;  %s1965_s16 = smov %s1517_s17 }
 0x444   : > { %s1966_s17 = smov %s1521_s18  ;;  %s1968_s19 = smov %s1529_s20 }
 0x445   :  { %36 = sbr.rel (!%p34_p2) target bundleno = 44 (0x2c), region = 102 }
 0x446   : > { %s1967_s18 = smov %s1960_s0 }
 0x447   : > { %s1969_s20 = smov %s1961_s28 }
 0x44c   :  { %974 = vsyncpa [#allocation11], 1 }
 0x44d   :  { %976 = vsyncpa [#allocation11 + $0x1], 1 }
 0x44e   :  { %977 = vsyncpa [#allocation12], 1 }
 0x44f   :  { %979 = vsyncpa [#allocation12 + $0x1], 1 }

</bundles_post_ra>
